<compile_context>
chip_gen: v7x
topology: tpu7x:2x2x1
jax: 0.10.0
libtpu: 0.0.40
codegen_flags: <defaults>
</compile_context>

<pallas_src>
import functools

import jax
import jax.numpy as jnp
from jax.experimental import pallas as pl
from jax.experimental.pallas import tpu as pltpu


def _round_up(n: int, m: int) -> int:
    return ((n + m - 1) // m) * m


def _make_kernel(temp: float, eps: float, use_bf16: bool):
    inv_temp = 1.0 / temp
    eps_sq = eps * eps

    def kernel(x_ref, w_ref, o_ref, acc_ref, sq_ref):
        # x_ref: (TILE_B, TILE_K)   w_ref: (TILE_K, TILE_C)   o_ref: (TILE_B, TILE_C)
        k = pl.program_id(2)

        @pl.when(k == 0)
        def _init():
            acc_ref[...] = jnp.zeros_like(acc_ref)
            sq_ref[...] = jnp.zeros_like(sq_ref)

        x = x_ref[...]  # f32 tile
        w = w_ref[...]

        # Partial row sum-of-squares (f32 VPU/XLU work, stays in f32 always).
        sq_ref[...] += jnp.sum(x * x, axis=-1, keepdims=True)

        # Partial matmul on the MXU, f32 accumulation.
        if use_bf16:
            x_mm = x.astype(jnp.bfloat16)
            w_mm = w.astype(jnp.bfloat16)
        else:
            x_mm = x
            w_mm = w
        acc_ref[...] += jnp.dot(x_mm, w_mm, preferred_element_type=jnp.float32)

        @pl.when(k == pl.num_programs(2) - 1)
        def _finalize():
            # scale = (1/temp) / max(||x||, eps) == (1/temp) * rsqrt(max(sumsq, eps^2))
            scale = inv_temp * jax.lax.rsqrt(jnp.maximum(sq_ref[...], eps_sq))
            o_ref[...] = (acc_ref[...] * scale).astype(o_ref.dtype)

    return kernel


@functools.partial(jax.jit, static_argnames=("temp", "eps", "use_bf16"))
def res_classifier_mme_forward(x, weight, temp: float = 0.05,
                               eps: float = 1e-12, use_bf16: bool = False):
    """Fused L2-normalize + bias-free linear + temperature scale.

    x:      (B, D)  float32
    weight: (C, D)  float32  (PyTorch nn.Linear layout)
    returns (B, C)  float32
    """
    B, D = x.shape
    C, D2 = weight.shape
    assert D == D2, "feature dims must match"

    # Lane-dense RHS: (D, C) so the output last dim C sits on lanes.
    wt = weight.T

    # Tile sizes: B rows in the 8..256 range, C/K multiples of 128,
    # sized so 2x double-buffered tiles stay far under 32 MiB scoped VMEM
    # (and v7x's 64 MiB physical VMEM).
    tile_b = min(256, _round_up(B, 8))
    tile_c = min(256, _round_up(C, 128))
    tile_k = min(512, _round_up(D, 128))

    b_pad = _round_up(B, tile_b)
    c_pad = _round_up(C, tile_c)
    d_pad = _round_up(D, tile_k)

    if (b_pad, d_pad) != (B, D):
        x = jnp.pad(x, ((0, b_pad - B), (0, d_pad - D)))
    if (d_pad, c_pad) != (D, C):
        wt = jnp.pad(wt, ((0, d_pad - D), (0, c_pad - C)))

    grid = (b_pad // tile_b, c_pad // tile_c, d_pad // tile_k)

    kernel = _make_kernel(temp, eps, use_bf16)

    out = pl.pallas_call(
        kernel,
        out_shape=jax.ShapeDtypeStruct((b_pad, c_pad), x.dtype),
        grid_spec=pltpu.PrefetchScalarGridSpec(
            num_scalar_prefetch=0,
            grid=grid,
            in_specs=[
                pl.BlockSpec((tile_b, tile_k), lambda i, j, k: (i, k)),
                pl.BlockSpec((tile_k, tile_c), lambda i, j, k: (k, j)),
            ],
            out_specs=pl.BlockSpec((tile_b, tile_c), lambda i, j, k: (i, j)),
            scratch_shapes=[
                pltpu.VMEM((tile_b, tile_c), jnp.float32),  # matmul accumulator
                pltpu.VMEM((tile_b, 1), jnp.float32),       # row sum-of-squares
            ],
        ),
        compiler_params=pltpu.CompilerParams(
            dimension_semantics=("parallel", "parallel", "arbitrary"),
        ),
    )(x, wt)

    return out[:B, :C]


def _reference_forward(x, weight, temp=0.05, eps=1e-12):
    # Pure-JAX reference mirroring PyTorch semantics.
    norm = jnp.maximum(jnp.linalg.norm(x, axis=1, keepdims=True), eps)
    xn = x / norm
    return (xn @ weight.T) / temp


if __name__ == "__main__":
    # Small shapes consistent with the module: batch=8, input_size=32, classes=12.
    B, D, C = 8, 32, 12
    temp = 0.05

    key = jax.random.PRNGKey(0)
    kx, kw = jax.random.split(key)

    x = jax.random.normal(kx, (B, D), dtype=jnp.float32)
    # weights_init: weight ~ Normal(0.0, 0.1), shape (num_classes, input_size)
    weight = 0.1 * jax.random.normal(kw, (C, D), dtype=jnp.float32)

    out = res_classifier_mme_forward(x, weight, temp=temp)
    out = jax.block_until_ready(out)

    ref = _reference_forward(x, weight, temp=temp)
    assert out.shape == (B, C)
    assert jnp.allclose(out, ref, atol=1e-4, rtol=1e-4), "mismatch vs reference"

    print("KERNEL_OK")
</pallas_src>

<mosaic_0001>
module attributes {stable_mosaic.version = 11 : i64} {
  func.func @kernel(%arg0: i32, %arg1: i32, %arg2: i32, %arg3: memref<8x128xf32, #tpu.memory_space<vmem>>, %arg4: memref<128x128xf32, #tpu.memory_space<vmem>>, %arg5: memref<8x128xf32, #tpu.memory_space<vmem>>, %arg6: memref<8x128xf32, #tpu.memory_space<vmem>>, %arg7: memref<8x1xf32, #tpu.memory_space<vmem>>) attributes {dimension_semantics = [#tpu.dimension_semantics<parallel>, #tpu.dimension_semantics<parallel>, #tpu.dimension_semantics<arbitrary>], iteration_bounds = array<i64: 1, 1, 1>, scalar_prefetch = 0 : i64, scratch_operands = 2 : i64, tpu.core_type = #tpu.core_type<tc>, window_params = [{transform_indices = @transform_0, window_bounds = array<i64: 8, 128>}, {transform_indices = @transform_1, window_bounds = array<i64: 128, 128>}, {transform_indices = @transform_2, window_bounds = array<i64: 8, 128>}]} {
    %c0_i32 = arith.constant 0 : i32
    %0 = arith.cmpi eq, %arg2, %c0_i32 : i32
    %1 = arith.extui %0 : i1 to i32
    %c0_i32_0 = arith.constant 0 : i32
    %2 = arith.cmpi ne, %1, %c0_i32_0 : i32
    scf.if %2 {
      %cst_15 = arith.constant 0.000000e+00 : f32
      %18 = vector.broadcast %cst_15 : f32 to vector<8x128xf32>
      %c0_16 = arith.constant 0 : index
      %c0_17 = arith.constant 0 : index
      %19 = vector.load %arg6[%c0_16, %c0_17] : memref<8x128xf32, #tpu.memory_space<vmem>>, vector<8x128xf32>
      tpu.vector_store %arg6[%c0_16, %c0_17], %18 {strides = array<i32>} : memref<8x128xf32, #tpu.memory_space<vmem>>, vector<8x128xf32>,
      %cst_18 = arith.constant 0.000000e+00 : f32
      %20 = vector.broadcast %cst_18 : f32 to vector<8x1xf32>
      %c0_19 = arith.constant 0 : index
      %c0_20 = arith.constant 0 : index
      %21 = vector.load %arg7[%c0_19, %c0_20] : memref<8x1xf32, #tpu.memory_space<vmem>>, vector<8x1xf32>
      tpu.vector_store %arg7[%c0_19, %c0_20], %20 {strides = array<i32>} : memref<8x1xf32, #tpu.memory_space<vmem>>, vector<8x1xf32>,
    } else {
    }
    %c0 = arith.constant 0 : index
    %c0_1 = arith.constant 0 : index
    %3 = vector.load %arg3[%c0, %c0_1] : memref<8x128xf32, #tpu.memory_space<vmem>>, vector<8x128xf32>
    %c0_2 = arith.constant 0 : index
    %c0_3 = arith.constant 0 : index
    %4 = vector.load %arg4[%c0_2, %c0_3] : memref<128x128xf32, #tpu.memory_space<vmem>>, vector<128x128xf32>
    %c0_4 = arith.constant 0 : index
    %c0_5 = arith.constant 0 : index
    %5 = vector.load %arg7[%c0_4, %c0_5] : memref<8x1xf32, #tpu.memory_space<vmem>>, vector<8x1xf32>
    %6 = arith.mulf %3, %3 : vector<8x128xf32>
    %cst = arith.constant dense<0.000000e+00> : vector<8xf32>
    %7 = vector.multi_reduction <add>, %6, %cst [1] : vector<8x128xf32> to vector<8xf32>
    %8 = vector.shape_cast %7 : vector<8xf32> to vector<8x1xf32>
    %9 = arith.addf %5, %8 : vector<8x1xf32>
    %c0_6 = arith.constant 0 : index
    %c0_7 = arith.constant 0 : index
    %10 = vector.load %arg7[%c0_6, %c0_7] : memref<8x1xf32, #tpu.memory_space<vmem>>, vector<8x1xf32>
    tpu.vector_store %arg7[%c0_6, %c0_7], %9 {strides = array<i32>} : memref<8x1xf32, #tpu.memory_space<vmem>>, vector<8x1xf32>,
    %c0_8 = arith.constant 0 : index
    %c0_9 = arith.constant 0 : index
    %11 = vector.load %arg6[%c0_8, %c0_9] : memref<8x128xf32, #tpu.memory_space<vmem>>, vector<8x128xf32>
    %cst_10 = arith.constant dense<0.000000e+00> : vector<8x128xf32>
    %12 = tpu.matmul %3, %4, %cst_10 {dimension_numbers = #tpu.dot_dimension_numbers<[1], [0], [0], [1], [0, 0, 1, 1], [], []>} : vector<8x128xf32>, vector<128x128xf32>, vector<8x128xf32> -> vector<8x128xf32>
    %13 = arith.addf %11, %12 : vector<8x128xf32>
    %c0_11 = arith.constant 0 : index
    %c0_12 = arith.constant 0 : index
    %14 = vector.load %arg6[%c0_11, %c0_12] : memref<8x128xf32, #tpu.memory_space<vmem>>, vector<8x128xf32>
    tpu.vector_store %arg6[%c0_11, %c0_12], %13 {strides = array<i32>} : memref<8x128xf32, #tpu.memory_space<vmem>>, vector<8x128xf32>,
    %c0_i32_13 = arith.constant 0 : i32
    %15 = arith.cmpi eq, %arg2, %c0_i32_13 : i32
    %16 = arith.extui %15 : i1 to i32
    %c0_i32_14 = arith.constant 0 : i32
    %17 = arith.cmpi ne, %16, %c0_i32_14 : i32
    scf.if %17 {
      %c0_15 = arith.constant 0 : index
      %c0_16 = arith.constant 0 : index
      %18 = vector.load %arg7[%c0_15, %c0_16] : memref<8x1xf32, #tpu.memory_space<vmem>>, vector<8x1xf32>
      %cst_17 = arith.constant 1.000000e-24 : f32
      %19 = vector.broadcast %cst_17 : f32 to vector<8x1xf32>
      %20 = arith.maximumf %18, %19 : vector<8x1xf32>
      %21 = math.rsqrt %20 : vector<8x1xf32>
      %cst_18 = arith.constant 2.000000e+01 : f32
      %22 = vector.broadcast %cst_18 : f32 to vector<8x1xf32>
      %23 = arith.mulf %22, %21 : vector<8x1xf32>
      %c0_19 = arith.constant 0 : index
      %c0_20 = arith.constant 0 : index
      %24 = vector.load %arg6[%c0_19, %c0_20] : memref<8x128xf32, #tpu.memory_space<vmem>>, vector<8x128xf32>
      %25 = vector.broadcast %23 : vector<8x1xf32> to vector<8x128xf32>
      %26 = arith.mulf %24, %25 : vector<8x128xf32>
      %c0_21 = arith.constant 0 : index
      %c0_22 = arith.constant 0 : index
      %27 = vector.load %arg5[%c0_21, %c0_22] : memref<8x128xf32, #tpu.memory_space<vmem>>, vector<8x128xf32>
      tpu.vector_store %arg5[%c0_21, %c0_22], %26 {strides = array<i32>} : memref<8x128xf32, #tpu.memory_space<vmem>>, vector<8x128xf32>,
    } else {
    }
    return
  }
  func.func @transform_0(%arg0: i32, %arg1: i32, %arg2: i32) -> (i32, i32) {
    %c0_i32 = arith.constant 0 : i32
    return %arg0, %arg2 : i32, i32
  }
  func.func @transform_1(%arg0: i32, %arg1: i32, %arg2: i32) -> (i32, i32) {
    %c0_i32 = arith.constant 0 : i32
    return %arg2, %arg1 : i32, i32
  }
  func.func @transform_2(%arg0: i32, %arg1: i32, %arg2: i32) -> (i32, i32) {
    %c0_i32 = arith.constant 0 : i32
    return %arg0, %arg1 : i32, i32
  }
}

</mosaic_0001>

<bundles_post_ra>
// kernel: res_classifier_mme_forward.1
= control target key start
LH: loop header
LB: loop body
LE: loop exit
PB: predicated region body
PF: predicated region fallthrough
CT: control target
= control target key end

     0   :  { %vm17_vm0 = vcmask 7168   ;;  %v253_v4 = vmov 0.0|0.0   ;;  %v254_v8 = vmov 0.0   ;;  %vm255_vm1 = vmmov 0   ;;  %s338_s0 = inlined_call_operand.vmem [shape: f32[8,128], index: 0, kind: input, shape index: {}]   ;;  %s339_s1 = inlined_call_operand.vmem [shape: f32[128,128], index: 1, kind: input, shape index: {}]   ;;  %s340_s2 = inlined_call_operand.hbm [shape: f32[8,128], index: 2, kind: output, shape index: {}]  }
   0x1   :  { %v19_v0 = vld [vmem:[%s338_s0] sm:$0xff]  ;;  %v21_v2 = vld [vmem:[%s339_s1 + $0x8] sm:$0xff]  ;;  %197 = vmatprep.subr.bf16.mxu0 %v253_v4  ;;  %v22_v6 = vld [vmem:[%s339_s1 + $0x10] sm:$0xff]  ;;  %18 = vst.msk [vmem:[#allocation3] sm:$0xff] %vm17_vm0, %v254_v8  ;;  %194 = vmatprep.mubr.msk.f32.mxu0 %vm255_vm1, %v254_v8 }
   0x2   :  { %v20_v1 = vld [vmem:[%s339_s1] sm:$0xff]  ;;  %v37_v3 = vmul.f32 %v19_v0, %v19_v0  ;;  %v23_v7 = vld [vmem:[%s339_s1 + $0x18] sm:$0xff]  ;;  %v25_v11 = vld [vmem:[%s339_s1 + $0x28] sm:$0xff] }
   0x3   :  { %v198_v5 = vpack.c.bf16 %v21_v2, %v20_v1  ;;  %v201_v9 = vpack.c.bf16 %v23_v7, %v22_v6  ;;  %v24_v10 = vld [vmem:[%s339_s1 + $0x20] sm:$0xff] }
   0x4   :  { %38 = vadd.xlane.f32.xlu0 %v37_v3 }
   0x5   :  { %199 = vmatpush3.bf16.msra.mxu0 %v198_v5 }
   0x6   :  { %200 = vmatprep.subr.bf16.mxu0 %v253_v4 }
   0x7   :  { %7 = vsyncpa [#allocation5], 0  ;;  %v204_v12 = vpack.c.bf16 %v25_v11, %v24_v10  ;;  %v26_v13 = vld [vmem:[%s339_s1 + $0x30] sm:$0xff]  ;;  %v27_v14 = vld [vmem:[%s339_s1 + $0x38] sm:$0xff]  ;;  %v256_v24 = vmov 0   ;;  %s257_s14 = smov [#allocation4]  }
   0x8   :  { %v207_v15 = vpack.c.bf16 %v27_v14, %v26_v13  ;;  %v28_v16 = vld [vmem:[%s339_s1 + $0x40] sm:$0xff]  ;;  %v29_v17 = vld [vmem:[%s339_s1 + $0x48] sm:$0xff]  ;;  %v30_v19 = vld [vmem:[%s339_s1 + $0x50] sm:$0xff]  ;;  %226 = vset.pattern.permute.xlu0 %v256_v24 }
   0x9   :  { %202 = vmatpush3.bf16.msra.mxu0 %v201_v9  ;;  %v210_v18 = vpack.c.bf16 %v29_v17, %v28_v16  ;;  %v31_v20 = vld [vmem:[%s339_s1 + $0x58] sm:$0xff]  ;;  %v32_v22 = vld [vmem:[%s339_s1 + $0x60] sm:$0xff]  ;;  %v33_v23 = vld [vmem:[%s339_s1 + $0x68] sm:$0xff] }
   0xa   :  { %203 = vmatprep.subr.bf16.mxu0 %v253_v4  ;;  %v213_v21 = vpack.c.bf16 %v31_v20, %v30_v19  ;;  %v216_v25 = vpack.c.bf16 %v33_v23, %v32_v22  ;;  %v34_v26 = vld [vmem:[%s339_s1 + $0x70] sm:$0xff]  ;;  %v35_v27 = vld [vmem:[%s339_s1 + $0x78] sm:$0xff]  ;;  %v36_v29 = vld [vmem:[#allocation3] sm:$0xff]  ;;  %s137_s1 = sshll.u32 %s257_s14, 4  ;;  %s138_s1 = int_to_ptr.vmem [resolvable:$true] %s137_s1 }
   0xb   :  { %v219_v28 = vpack.c.bf16 %v35_v27, %v34_v26  ;;  %s229_s15 = scalar_lea.vmem %s138_s1, 128  ;;  %p234_p1 = scmp.lt.s32.totalorder %s138_s1, %s138_s1 }
   0xc   :  { %p230_p0 = scmp.ne.s32.totalorder %s138_s1, %s229_s15  ;;  %p235_p2 = scmp.lt.s32.totalorder %s229_s15, %s229_s15 }
   0xd   :  { %205 = vmatpush3.bf16.msra.mxu0 %v204_v12 }
   0xe   :  { %206 = vmatprep.subr.bf16.mxu0 %v253_v4  ;;  %p236_p3 = por %p235_p2, %p234_p1 }
  0x10   :  { %p237_p4 = pnand %p236_p3, %p230_p0 }
  0x11   :  { %208 = vmatpush3.bf16.msra.mxu0 %v207_v15 }
  0x12   :  { %209 = vmatprep.subr.bf16.mxu0 %v253_v4 }
  0x15   :  { %211 = vmatpush3.bf16.msra.mxu0 %v210_v18 }
  0x16   :  { %212 = vmatprep.subr.bf16.mxu0 %v253_v4 }
  0x19   :  { %214 = vmatpush3.bf16.msra.mxu0 %v213_v21 }
  0x1a   :  { %215 = vmatprep.subr.bf16.mxu0 %v253_v4 }
  0x1d   :  { %217 = vmatpush3.bf16.msra.mxu0 %v216_v25 }
  0x1e   :  { %218 = vmatprep.subr.bf16.mxu0 %v253_v4 }
  0x21   :  { %220 = vmatpush3.bf16.msra.mxu0 %v219_v28 }
  0x24   :  { %195 = vmatmul.mubr.f32.vlgmr.msra.gmra.mrb[0].mxu0 %v19_v0 }
  0x91   :  { %v39_v30 = vpop.xlane.xlu0 %38 }
  0x92   :  { %v40_v31 = vadd.f32 %v39_v30, %v36_v29 }
  0x94   :  { %42 = vst.msk [vmem:[#allocation3] sm:$0xff] %vm17_vm0, %v40_v31 }
  0x9b   :  { %v119_v32 = vld [vmem:[#allocation3] sm:$0xff] }
  0x9c   :  { %v120_v33 = vmax.f32 %v119_v32, 1e-24 }
  0x9e   :  { %227 = vrsqrt.f32 %v120_v33 }
  0xa8   :  { %v228_v34 = vpop.eup %227 }
  0xa9   :  { %v122_v35 = vmul.f32 20.0, %v228_v34 }
  0xab   :  { %126 = vperm.xlu0 %226, %v122_v35  }
  0xf7   :  { %v110_v36 = vpop.f32.mrb[0].mxu0 }
  0xf8   :  { %v196_v37 = vpop.f32.mrb[1].mxu0 }
 0x12a   :  { %v127_v38 = vpop.permute.xlu0 %126 }
 0x12b   :  { %v129_v39 = vmul.f32 %v127_v38, %v110_v36 }
 0x12d   :  { %130 = vst [vmem:[#allocation4] sm:$0xff] %v129_v39 }
 0x12e   :  { %240 = shalt.err (!%p237_p4)
}
 0x12f   :  { %s241_s18 = scalar_lea.hbm %s340_s2, 128 }
 0x130   :  { %p242_p5 = scmp.ne.s32.totalorder %s340_s2, %s241_s18  ;;  %p245_p6 = scmp.lt.u32.totalorder %s241_s18, %s340_s2 }
 0x132   :  { %p247_p7 = pnand %p245_p6, %p242_p5 }
 0x134   :  { %250 = shalt.err (!%p247_p7)
}
 0x135   :  { %140 = dma.vmem_to_hbm [thread:$0]  %s138_s1, 128, %s340_s2, [#allocation5]  }
 0x136   :  { %251 = dma.done.wait [#allocation5], 128  }
 0x137   :  { %252 = vsyncadd [#allocation5], 4294967168 }
 0x138   :  { %144 = vsyncpa [#allocation5], 1 }

</bundles_post_ra>
